<compile_context>
chip_gen: v6e
topology: v6e:2x2x1
jax: 0.10.0
libtpu: 0.0.40
codegen_flags: <defaults>
</compile_context>

<pallas_src>
import functools

import jax
import jax.numpy as jnp
from jax.experimental import pallas as pl
from jax.experimental.pallas import tpu as pltpu


# ----------------------------- kernel -----------------------------------------------------


def _classifier_kernel(x_ptm_ref, m_ref,
                       w_mlp_ref, b_mlp_ref,
                       w_d_ptm_ref, w_d_mlp_ref, b_d_ref,
                       w_out_ref, b_out_ref,
                       logits_ref):
    # ---- x_mlp = tanh(mlp_inputs @ W_mlp + b_mlp) ----  (bf16 in, f32 accumulate)
    x_mlp = jnp.tanh(
        jnp.dot(m_ref[...], w_mlp_ref[...], preferred_element_type=jnp.float32)
        + b_mlp_ref[...]
    )

    # ---- x = tanh(cat(x_ptm, x_mlp) @ W_dense + b_dense) ----
    # cat-then-matmul == x_ptm @ W_dense[:H] + x_mlp @ W_dense[H:]
    h = jnp.tanh(
        jnp.dot(x_ptm_ref[...], w_d_ptm_ref[...], preferred_element_type=jnp.float32)
        + jnp.dot(x_mlp.astype(jnp.bfloat16), w_d_mlp_ref[...],
                  preferred_element_type=jnp.float32)
        + b_d_ref[...]
    )

    # ---- logits = x @ W_out + b_out ----  (lane-dense 128-wide f32 store)
    logits_ref[...] = (
        jnp.dot(h.astype(jnp.bfloat16), w_out_ref[...],
                preferred_element_type=jnp.float32)
        + b_out_ref[...]
    )


# ----------------------------- wrapper -----------------------------------------------------


def _round_up(x, m):
    return ((x + m - 1) // m) * m


def _pad2(x, rows, cols, dtype):
    """Zero-pad a 2-D array to (rows, cols) and cast."""
    r, c = x.shape
    out = jnp.zeros((rows, cols), dtype)
    return out.at[:r, :c].set(x.astype(dtype))


@functools.partial(jax.jit, static_argnames=("batch_tile",))
def commit_metric_classifier_forward(x_ptm, mlp_inputs, params, *, batch_tile=512):
    """params: dict of pre-transposed (in, out) f32 weights and (1, out) f32 biases."""
    B, H = x_ptm.shape
    K = mlp_inputs.shape[1]                 # n_metric
    Hm = params["w_mlp"].shape[1]           # mlp_hidden
    C = params["w_out"].shape[1]            # n_class

    # Lane/MXU-friendly padded dims (all exact, see header).
    H_p = _round_up(H, 128)
    K_p = _round_up(K, 128)
    Hm_p = _round_up(Hm, 128)
    C_p = _round_up(C, 128)

    # Batch tile: largest of <= batch_tile rows; keeps resident weights + double-buffered
    # activation tiles far below v7x's 32 MiB scoped VMEM at production H.
    TB = min(batch_tile, _round_up(B, 8))
    B_p = _round_up(B, TB)
    nb = B_p // TB

    bf16 = jnp.bfloat16
    f32 = jnp.float32

    # Activations: bf16, zero-padded (padding rows/cols contribute nothing).
    x_ptm_p = _pad2(x_ptm, B_p, H_p, bf16)
    m_p = _pad2(mlp_inputs, B_p, K_p, bf16)

    # Weights: bf16, zero-padded. Biases: f32 (tiny), zero-padded to lane width.
    w_mlp = _pad2(params["w_mlp"], K_p, Hm_p, bf16)
    b_mlp = _pad2(params["b_mlp"], 1, Hm_p, f32)
    w_d_ptm = _pad2(params["w_d_ptm"], H_p, H_p, bf16)
    w_d_mlp = _pad2(params["w_d_mlp"], Hm_p, H_p, bf16)
    b_d = _pad2(params["b_d"], 1, H_p, f32)
    w_out = _pad2(params["w_out"], H_p, C_p, bf16)
    b_out = _pad2(params["b_out"], 1, C_p, f32)

    # BlockSpecs: activations/output tiled over batch; weights/biases VMEM-resident.
    act_spec = lambda cols: pl.BlockSpec((TB, cols), lambda i: (i, 0))
    res_spec = lambda shape: pl.BlockSpec(shape, lambda i: (0, 0))

    in_specs = [
        act_spec(H_p),                 # x_ptm tile
        act_spec(K_p),                 # mlp_inputs tile
        res_spec((K_p, Hm_p)),         # w_mlp
        res_spec((1, Hm_p)),           # b_mlp
        res_spec((H_p, H_p)),          # w_d_ptm
        res_spec((Hm_p, H_p)),         # w_d_mlp
        res_spec((1, H_p)),            # b_d
        res_spec((H_p, C_p)),          # w_out
        res_spec((1, C_p)),            # b_out
    ]
    out_spec = act_spec(C_p)

    flops = 2 * B_p * (K_p * Hm_p + (H_p + Hm_p) * H_p + H_p * C_p)
    bytes_accessed = (
        x_ptm_p.size * 2 + m_p.size * 2
        + (w_mlp.size + w_d_ptm.size + w_d_mlp.size + w_out.size) * 2
        + (b_mlp.size + b_d.size + b_out.size) * 4
        + B_p * C_p * 4
    )
    cost = pl.CostEstimate(
        flops=flops,
        transcendentals=B_p * (Hm_p + H_p),
        bytes_accessed=bytes_accessed,
    )

    logits_p = pl.pallas_call(
        _classifier_kernel,
        out_shape=jax.ShapeDtypeStruct((B_p, C_p), f32),
        grid=(nb,),
        in_specs=in_specs,
        out_specs=out_spec,
        compiler_params=pltpu.CompilerParams(
            dimension_semantics=("parallel",),
        ),
        cost_estimate=cost,
    )(x_ptm_p, m_p, w_mlp, b_mlp, w_d_ptm, w_d_mlp, b_d, w_out, b_out)

    return logits_p[:B, :C]


# ----------------------------- params / reference ------------------------------------------


def init_params(key, ptm_hidden, n_metric, mlp_hidden, n_class):
    ks = jax.random.split(key, 6)
    scale = 0.02
    # weights stored as (in_features, out_features)  (PyTorch Linear W is (out, in))
    w_mlp = scale * jax.random.normal(ks[0], (n_metric, mlp_hidden), jnp.float32)
    b_mlp = scale * jax.random.normal(ks[1], (1, mlp_hidden), jnp.float32)
    w_dense = scale * jax.random.normal(
        ks[2], (ptm_hidden + mlp_hidden, ptm_hidden), jnp.float32)
    b_d = scale * jax.random.normal(ks[3], (1, ptm_hidden), jnp.float32)
    w_out = scale * jax.random.normal(ks[4], (ptm_hidden, n_class), jnp.float32)
    b_out = scale * jax.random.normal(ks[5], (1, n_class), jnp.float32)
    return {
        "w_mlp": w_mlp, "b_mlp": b_mlp,
        "w_d_ptm": w_dense[:ptm_hidden], "w_d_mlp": w_dense[ptm_hidden:],
        "b_d": b_d,
        "w_out": w_out, "b_out": b_out,
        "w_dense_full": w_dense,  # kept for the pure-JAX reference check
    }


def reference_forward(x_ptm, mlp_inputs, params):
    x_mlp = jnp.tanh(mlp_inputs @ params["w_mlp"] + params["b_mlp"])
    x = jnp.concatenate([x_ptm, x_mlp], axis=1)
    x = jnp.tanh(x @ params["w_dense_full"] + params["b_d"])
    return x @ params["w_out"] + params["b_out"]


# ----------------------------- self-test ----------------------------------------------------


if __name__ == "__main__":
    B = 2            # batch
    PTM_HIDDEN = 32  # ptm_config.hidden_size (small synthetic size)
    N_METRIC = 8     # len(metrics[0][0])
    MLP_HIDDEN = 32
    N_CLASS = 2

    key = jax.random.PRNGKey(0)
    k_params, k_ptm, k_mlp = jax.random.split(key, 3)

    params = init_params(k_params, PTM_HIDDEN, N_METRIC, MLP_HIDDEN, N_CLASS)
    # pooled transformer output stands in for self.ptm(**ptm_inputs).pooler_output
    x_ptm = jax.random.normal(k_ptm, (B, PTM_HIDDEN), jnp.float32)
    mlp_inputs = jax.random.normal(k_mlp, (B, N_METRIC), jnp.float32)

    logits = commit_metric_classifier_forward(x_ptm, mlp_inputs, params)
    logits = jax.block_until_ready(logits)

    ref = reference_forward(x_ptm, mlp_inputs, params)
    assert logits.shape == (B, N_CLASS)
    # bf16 inputs / f32 accumulation -> looser tolerance than pure-f32.
    assert jnp.allclose(logits, ref, atol=1e-2, rtol=1e-1), "mismatch vs JAX reference"

    print("KERNEL_OK")
</pallas_src>

<mosaic_0001>
module attributes {stable_mosaic.version = 11 : i64} {
  func.func @_classifier_kernel(%arg0: i32, %arg1: memref<8x128xbf16, #tpu.memory_space<vmem>>, %arg2: memref<8x128xbf16, #tpu.memory_space<vmem>>, %arg3: memref<128x128xbf16, #tpu.memory_space<vmem>>, %arg4: memref<1x128xf32, #tpu.memory_space<vmem>>, %arg5: memref<128x128xbf16, #tpu.memory_space<vmem>>, %arg6: memref<128x128xbf16, #tpu.memory_space<vmem>>, %arg7: memref<1x128xf32, #tpu.memory_space<vmem>>, %arg8: memref<128x128xbf16, #tpu.memory_space<vmem>>, %arg9: memref<1x128xf32, #tpu.memory_space<vmem>>, %arg10: memref<8x128xf32, #tpu.memory_space<vmem>>) attributes {dimension_semantics = [#tpu.dimension_semantics<parallel>], iteration_bounds = array<i64: 1>, scalar_prefetch = 0 : i64, scratch_operands = 0 : i64, tpu.core_type = #tpu.core_type<tc>, window_params = [{transform_indices = @transform_0, window_bounds = array<i64: 8, 128>}, {transform_indices = @transform_1, window_bounds = array<i64: 8, 128>}, {pipeline_mode = #tpu.pipeline_mode<synchronous>, transform_indices = @transform_2, window_bounds = array<i64: 128, 128>}, {pipeline_mode = #tpu.pipeline_mode<synchronous>, transform_indices = @transform_3, window_bounds = array<i64: 1, 128>}, {pipeline_mode = #tpu.pipeline_mode<synchronous>, transform_indices = @transform_4, window_bounds = array<i64: 128, 128>}, {pipeline_mode = #tpu.pipeline_mode<synchronous>, transform_indices = @transform_5, window_bounds = array<i64: 128, 128>}, {pipeline_mode = #tpu.pipeline_mode<synchronous>, transform_indices = @transform_6, window_bounds = array<i64: 1, 128>}, {pipeline_mode = #tpu.pipeline_mode<synchronous>, transform_indices = @transform_7, window_bounds = array<i64: 128, 128>}, {pipeline_mode = #tpu.pipeline_mode<synchronous>, transform_indices = @transform_8, window_bounds = array<i64: 1, 128>}, {transform_indices = @transform_9, window_bounds = array<i64: 8, 128>}]} {
    %c0 = arith.constant 0 : index
    %c0_0 = arith.constant 0 : index
    %0 = vector.load %arg2[%c0, %c0_0] : memref<8x128xbf16, #tpu.memory_space<vmem>>, vector<8x128xbf16>
    %c0_1 = arith.constant 0 : index
    %c0_2 = arith.constant 0 : index
    %1 = vector.load %arg3[%c0_1, %c0_2] : memref<128x128xbf16, #tpu.memory_space<vmem>>, vector<128x128xbf16>
    %cst = arith.constant dense<0.000000e+00> : vector<8x128xf32>
    %2 = tpu.matmul %0, %1, %cst {dimension_numbers = #tpu.dot_dimension_numbers<[1], [0], [0], [1], [0, 0, 1, 1], [], []>} : vector<8x128xbf16>, vector<128x128xbf16>, vector<8x128xf32> -> vector<8x128xf32>
    %c0_3 = arith.constant 0 : index
    %c0_4 = arith.constant 0 : index
    %3 = vector.load %arg4[%c0_3, %c0_4] : memref<1x128xf32, #tpu.memory_space<vmem>>, vector<1x128xf32>
    %4 = vector.broadcast %3 : vector<1x128xf32> to vector<8x128xf32>
    %5 = arith.addf %2, %4 : vector<8x128xf32>
    %6 = math.tanh %5 : vector<8x128xf32>
    %c0_5 = arith.constant 0 : index
    %c0_6 = arith.constant 0 : index
    %7 = vector.load %arg1[%c0_5, %c0_6] : memref<8x128xbf16, #tpu.memory_space<vmem>>, vector<8x128xbf16>
    %c0_7 = arith.constant 0 : index
    %c0_8 = arith.constant 0 : index
    %8 = vector.load %arg5[%c0_7, %c0_8] : memref<128x128xbf16, #tpu.memory_space<vmem>>, vector<128x128xbf16>
    %cst_9 = arith.constant dense<0.000000e+00> : vector<8x128xf32>
    %9 = tpu.matmul %7, %8, %cst_9 {dimension_numbers = #tpu.dot_dimension_numbers<[1], [0], [0], [1], [0, 0, 1, 1], [], []>} : vector<8x128xbf16>, vector<128x128xbf16>, vector<8x128xf32> -> vector<8x128xf32>
    %10 = arith.truncf %6 : vector<8x128xf32> to vector<8x128xbf16>
    %c0_10 = arith.constant 0 : index
    %c0_11 = arith.constant 0 : index
    %11 = vector.load %arg6[%c0_10, %c0_11] : memref<128x128xbf16, #tpu.memory_space<vmem>>, vector<128x128xbf16>
    %cst_12 = arith.constant dense<0.000000e+00> : vector<8x128xf32>
    %12 = tpu.matmul %10, %11, %cst_12 {dimension_numbers = #tpu.dot_dimension_numbers<[1], [0], [0], [1], [0, 0, 1, 1], [], []>} : vector<8x128xbf16>, vector<128x128xbf16>, vector<8x128xf32> -> vector<8x128xf32>
    %13 = arith.addf %9, %12 : vector<8x128xf32>
    %c0_13 = arith.constant 0 : index
    %c0_14 = arith.constant 0 : index
    %14 = vector.load %arg7[%c0_13, %c0_14] : memref<1x128xf32, #tpu.memory_space<vmem>>, vector<1x128xf32>
    %15 = vector.broadcast %14 : vector<1x128xf32> to vector<8x128xf32>
    %16 = arith.addf %13, %15 : vector<8x128xf32>
    %17 = math.tanh %16 : vector<8x128xf32>
    %18 = arith.truncf %17 : vector<8x128xf32> to vector<8x128xbf16>
    %c0_15 = arith.constant 0 : index
    %c0_16 = arith.constant 0 : index
    %19 = vector.load %arg8[%c0_15, %c0_16] : memref<128x128xbf16, #tpu.memory_space<vmem>>, vector<128x128xbf16>
    %cst_17 = arith.constant dense<0.000000e+00> : vector<8x128xf32>
    %20 = tpu.matmul %18, %19, %cst_17 {dimension_numbers = #tpu.dot_dimension_numbers<[1], [0], [0], [1], [0, 0, 1, 1], [], []>} : vector<8x128xbf16>, vector<128x128xbf16>, vector<8x128xf32> -> vector<8x128xf32>
    %c0_18 = arith.constant 0 : index
    %c0_19 = arith.constant 0 : index
    %21 = vector.load %arg9[%c0_18, %c0_19] : memref<1x128xf32, #tpu.memory_space<vmem>>, vector<1x128xf32>
    %22 = vector.broadcast %21 : vector<1x128xf32> to vector<8x128xf32>
    %23 = arith.addf %20, %22 : vector<8x128xf32>
    %c0_20 = arith.constant 0 : index
    %c0_21 = arith.constant 0 : index
    %24 = vector.load %arg10[%c0_20, %c0_21] : memref<8x128xf32, #tpu.memory_space<vmem>>, vector<8x128xf32>
    tpu.vector_store %arg10[%c0_20, %c0_21], %23 {strides = array<i32>} : memref<8x128xf32, #tpu.memory_space<vmem>>, vector<8x128xf32>,
    return
  }
  func.func @transform_0(%arg0: i32) -> (i32, i32) {
    %c0_i32 = arith.constant 0 : i32
    %c0_i32_0 = arith.constant 0 : i32
    return %arg0, %c0_i32 : i32, i32
  }
  func.func @transform_1(%arg0: i32) -> (i32, i32) {
    %c0_i32 = arith.constant 0 : i32
    %c0_i32_0 = arith.constant 0 : i32
    return %arg0, %c0_i32 : i32, i32
  }
  func.func @transform_2(%arg0: i32) -> (i32, i32) {
    %c0_i32 = arith.constant 0 : i32
    %c0_i32_0 = arith.constant 0 : i32
    %c0_i32_1 = arith.constant 0 : i32
    return %c0_i32, %c0_i32_0 : i32, i32
  }
  func.func @transform_3(%arg0: i32) -> (i32, i32) {
    %c0_i32 = arith.constant 0 : i32
    %c0_i32_0 = arith.constant 0 : i32
    %c0_i32_1 = arith.constant 0 : i32
    return %c0_i32, %c0_i32_0 : i32, i32
  }
  func.func @transform_4(%arg0: i32) -> (i32, i32) {
    %c0_i32 = arith.constant 0 : i32
    %c0_i32_0 = arith.constant 0 : i32
    %c0_i32_1 = arith.constant 0 : i32
    return %c0_i32, %c0_i32_0 : i32, i32
  }
  func.func @transform_5(%arg0: i32) -> (i32, i32) {
    %c0_i32 = arith.constant 0 : i32
    %c0_i32_0 = arith.constant 0 : i32
    %c0_i32_1 = arith.constant 0 : i32
    return %c0_i32, %c0_i32_0 : i32, i32
  }
  func.func @transform_6(%arg0: i32) -> (i32, i32) {
    %c0_i32 = arith.constant 0 : i32
    %c0_i32_0 = arith.constant 0 : i32
    %c0_i32_1 = arith.constant 0 : i32
    return %c0_i32, %c0_i32_0 : i32, i32
  }
  func.func @transform_7(%arg0: i32) -> (i32, i32) {
    %c0_i32 = arith.constant 0 : i32
    %c0_i32_0 = arith.constant 0 : i32
    %c0_i32_1 = arith.constant 0 : i32
    return %c0_i32, %c0_i32_0 : i32, i32
  }
  func.func @transform_8(%arg0: i32) -> (i32, i32) {
    %c0_i32 = arith.constant 0 : i32
    %c0_i32_0 = arith.constant 0 : i32
    %c0_i32_1 = arith.constant 0 : i32
    return %c0_i32, %c0_i32_0 : i32, i32
  }
  func.func @transform_9(%arg0: i32) -> (i32, i32) {
    %c0_i32 = arith.constant 0 : i32
    %c0_i32_0 = arith.constant 0 : i32
    return %arg0, %c0_i32 : i32, i32
  }
}

</mosaic_0001>

<bundles_post_ra>
// kernel: commit_metric_classifier_forward.1
= control target key start
LH: loop header
LB: loop body
LE: loop exit
PB: predicated region body
PF: predicated region fallthrough
CT: control target
= control target key end

     0   :  { %v671_v0 = vmov 0.0   ;;  %vm672_vm0 = vmmov 0   ;;  %s877_s2 = inlined_call_operand.vmem [shape: bf16[128,128], index: 2, kind: input, shape index: {}]   ;;  %s878_s4 = inlined_call_operand.vmem [shape: bf16[128,128], index: 4, kind: input, shape index: {}]   ;;  %s879_s5 = inlined_call_operand.vmem [shape: bf16[128,128], index: 5, kind: input, shape index: {}]   ;;  %s880_s1 = inlined_call_operand.vmem [shape: bf16[8,128], index: 1, kind: input, shape index: {}]   ;;  %s881_s0 = inlined_call_operand.vmem [shape: bf16[8,128], index: 0, kind: input, shape index: {}]   ;;  %s882_s7 = inlined_call_operand.vmem [shape: bf16[128,128], index: 7, kind: input, shape index: {}]   ;;  %s883_s3 = inlined_call_operand.vmem [shape: f32[1,128], index: 3, kind: input, shape index: {}]   ;;  %s884_s6 = inlined_call_operand.vmem [shape: f32[1,128], index: 6, kind: input, shape index: {}]   ;;  %s885_s8 = inlined_call_operand.vmem [shape: f32[1,128], index: 8, kind: input, shape index: {}]   ;;  %s886_s9 = inlined_call_operand.vmem [shape: f32[8,128], index: 9, kind: output, shape index: {}]  }
   0x1   :  { %553 = vmatprep.subr.bf16.mxu0 %v671_v0  ;;  %v635_v1 = vld [vmem:[%s877_s2 + $0x38] sm:$0xff]   ;;  %569 = vmatprep.mubr.msk.bf16.mxu0 %vm672_vm0, %v671_v0  ;;  %v636_v2 = vld [vmem:[%s877_s2 + $0x30] sm:$0xff]   ;;  %v637_v3 = vld [vmem:[%s877_s2 + $0x28] sm:$0xff]  }
   0x2   :  { %573 = vmatprep.subr.bf16.mxu1 %v671_v0  ;;  %589 = vmatprep.mubr.msk.bf16.mxu1 %vm672_vm0, %v671_v0  ;;  %v638_v4 = vld [vmem:[%s877_s2 + $0x20] sm:$0xff]   ;;  %v645_v5 = vld [vmem:[%s879_s5 + $0x38] sm:$0xff]   ;;  %v647_v6 = vld [vmem:[%s879_s5 + $0x30] sm:$0xff]  }
   0x3   :  { %554 = vmatpush3.bf16.msra.mxu0 %v635_v1  ;;  %574 = vmatpush3.bf16.msra.mxu1 %v645_v5  ;;  %v639_v7 = vld [vmem:[%s877_s2 + $0x18] sm:$0xff]   ;;  %v640_v8 = vld [vmem:[%s877_s2 + $0x10] sm:$0xff]   ;;  %v649_v9 = vld [vmem:[%s879_s5 + $0x28] sm:$0xff]  }
   0x4   :  { %555 = vmatprep.subr.bf16.mxu0 %v671_v0  ;;  %575 = vmatprep.subr.bf16.mxu1 %v671_v0  ;;  %v641_v10 = vld [vmem:[%s877_s2 + $0x8] sm:$0xff]   ;;  %v642_v11 = vld [vmem:[%s877_s2] sm:$0xff]   ;;  %v643_v13 = vld [vmem:[%s878_s4 + $0x38] sm:$0xff]  }
   0x5   :  { %v33_v12 = vld [vmem:[%s880_s1] sm:$0xf]  ;;  %v644_v14 = vld [vmem:[%s878_s4 + $0x30] sm:$0xff]   ;;  %v646_v15 = vld [vmem:[%s878_s4 + $0x28] sm:$0xff]  }
   0x6   :  { %v648_v16 = vld [vmem:[%s878_s4 + $0x20] sm:$0xff]   ;;  %v650_v17 = vld [vmem:[%s878_s4 + $0x18] sm:$0xff]   ;;  %v652_v19 = vld [vmem:[%s878_s4 + $0x10] sm:$0xff]  }
   0x7   :  { %556 = vmatpush3.bf16.msra.mxu0 %v636_v2  ;;  %576 = vmatpush3.bf16.msra.mxu1 %v647_v6  ;;  %v651_v18 = vld [vmem:[%s879_s5 + $0x20] sm:$0xff]   ;;  %v653_v20 = vld [vmem:[%s879_s5 + $0x18] sm:$0xff]   ;;  %v654_v21 = vld [vmem:[%s878_s4 + $0x8] sm:$0xff]  }
   0x8   :  { %557 = vmatprep.subr.bf16.mxu0 %v671_v0  ;;  %577 = vmatprep.subr.bf16.mxu1 %v671_v0  ;;  %v655_v22 = vld [vmem:[%s879_s5 + $0x10] sm:$0xff]   ;;  %v656_v23 = vld [vmem:[%s878_s4] sm:$0xff]   ;;  %v657_v24 = vld [vmem:[%s879_s5 + $0x8] sm:$0xff]  }
   0x9   :  { %v146_v25 = vld [vmem:[%s881_s0] sm:$0xf]  ;;  %v659_v34 = vld [vmem:[%s882_s7 + $0x38] sm:$0xff]   ;;  %v660_v36 = vld [vmem:[%s882_s7 + $0x30] sm:$0xff]  }
   0xa   :  { %v658_v26 = vld [vmem:[%s879_s5] sm:$0xff]   ;;  %v661_v37 = vld [vmem:[%s882_s7 + $0x28] sm:$0xff]   ;;  %v663_v43 = vld [vmem:[%s882_s7 + $0x18] sm:$0xff]  }
   0xb   :  { %558 = vmatpush3.bf16.msra.mxu0 %v637_v3  ;;  %578 = vmatpush3.bf16.msra.mxu1 %v649_v9  ;;  %v482_v27 = vld [vmem:[%s883_s3] ss:$0 sm:$0xff]  ;;  %v664_v44 = vld [vmem:[%s882_s7 + $0x10] sm:$0xff]   ;;  %v665_v45 = vld [vmem:[%s882_s7 + $0x8] sm:$0xff]  }
   0xc   :  { %559 = vmatprep.subr.bf16.mxu0 %v671_v0  ;;  %579 = vmatprep.subr.bf16.mxu1 %v671_v0  ;;  %v662_v42 = vld [vmem:[%s882_s7 + $0x20] sm:$0xff]  }
   0xd   :  { %v666_v46 = vld [vmem:[%s882_s7] sm:$0xff]  }
   0xe   :  { %v507_v48 = vld [vmem:[%s884_s6] ss:$0 sm:$0xff] }
   0xf   :  { %560 = vmatpush3.bf16.msra.mxu0 %v638_v4  ;;  %580 = vmatpush3.bf16.msra.mxu1 %v651_v18  ;;  %v508_v56 = vld [vmem:[%s885_s8] ss:$0 sm:$0xff] }
  0x10   :  { %561 = vmatprep.subr.bf16.mxu0 %v671_v0  ;;  %581 = vmatprep.subr.bf16.mxu1 %v671_v0 }
  0x13   :  { %562 = vmatpush3.bf16.msra.mxu0 %v639_v7  ;;  %582 = vmatpush3.bf16.msra.mxu1 %v653_v20 }
  0x14   :  { %563 = vmatprep.subr.bf16.mxu0 %v671_v0  ;;  %583 = vmatprep.subr.bf16.mxu1 %v671_v0 }
  0x17   :  { %564 = vmatpush3.bf16.msra.mxu0 %v640_v8  ;;  %584 = vmatpush3.bf16.msra.mxu1 %v655_v22 }
  0x18   :  { %565 = vmatprep.subr.bf16.mxu0 %v671_v0  ;;  %585 = vmatprep.subr.bf16.mxu1 %v671_v0 }
  0x1b   :  { %566 = vmatpush3.bf16.msra.mxu0 %v641_v10  ;;  %586 = vmatpush3.bf16.msra.mxu1 %v657_v24 }
  0x1c   :  { %567 = vmatprep.subr.bf16.mxu0 %v671_v0  ;;  %587 = vmatprep.subr.bf16.mxu1 %v671_v0 }
  0x1f   :  { %568 = vmatpush3.bf16.msra.mxu0 %v642_v11  ;;  %588 = vmatpush3.bf16.msra.mxu1 %v658_v26 }
  0x20   :  { %593 = vmatprep.subr.bf16.mxu0 %v671_v0  ;;  %613 = vmatprep.subr.bf16.mxu1 %v671_v0 }
  0x22   :  { %570 = vmatmul.mubr.bf16.vlgmr.msra.gmra.mxu0 %v33_v12 }
  0x23   :  { %594 = vmatpush3.bf16.msra.mxu0 %v643_v13  ;;  %609 = vmatprep.mubr.msk.bf16.mxu0 %vm672_vm0, %v671_v0 }
  0x24   :  { %595 = vmatprep.subr.bf16.mxu0 %v671_v0 }
  0x27   :  { %596 = vmatpush3.bf16.msra.mxu0 %v644_v14 }
  0x28   :  { %597 = vmatprep.subr.bf16.mxu0 %v671_v0 }
  0x2b   :  { %598 = vmatpush3.bf16.msra.mxu0 %v646_v15 }
  0x2c   :  { %599 = vmatprep.subr.bf16.mxu0 %v671_v0 }
  0x2f   :  { %600 = vmatpush3.bf16.msra.mxu0 %v648_v16 }
  0x30   :  { %601 = vmatprep.subr.bf16.mxu0 %v671_v0 }
  0x33   :  { %602 = vmatpush3.bf16.msra.mxu0 %v650_v17 }
  0x34   :  { %603 = vmatprep.subr.bf16.mxu0 %v671_v0 }
  0x37   :  { %604 = vmatpush3.bf16.msra.mxu0 %v652_v19 }
  0x38   :  { %605 = vmatprep.subr.bf16.mxu0 %v671_v0 }
  0x3b   :  { %606 = vmatpush3.bf16.msra.mxu0 %v654_v21 }
  0x3c   :  { %607 = vmatprep.subr.bf16.mxu0 %v671_v0 }
  0x3f   :  { %608 = vmatpush3.bf16.msra.mxu0 %v656_v23 }
  0x42   :  { %610 = vmatmul.mubr.bf16.vlgmr.msra.gmra.mxu0 %v146_v25 }
  0xe2   :  { %v139_v28 = vpop.f32.mrf.mxu0 }
  0xe3   :  { %v140_v29 = vadd.f32 %v482_v27, %v139_v28 }
  0xe4   :  { %v571_v30 = vpop.f32.mrf.mxu0 }
  0xe5   :  { %667 = vtanh.f32 %v140_v29 }
  0xe6   :  { %v142_v31 = vpop.f32.mrf.mxu0 }
  0xe8   :  { %v572_v32 = vpop.f32.mrf.mxu0 }
  0xf2   :  { %v668_v33 = vpop.eup %667 }
  0xf3   :  { %v163_v35 = vpack.c.bf16 %v668_v33, %v668_v33 }
  0xf5   :  { %590 = vmatmul.mubr.bf16.vlgmr.msra.gmra.mxu1 %v163_v35 }
  0xf6   :  { %614 = vmatpush3.bf16.msra.mxu1 %v659_v34  ;;  %629 = vmatprep.mubr.msk.bf16.mxu1 %vm672_vm0, %v671_v0 }
  0xf7   :  { %615 = vmatprep.subr.bf16.mxu1 %v671_v0 }
  0xfa   :  { %616 = vmatpush3.bf16.msra.mxu1 %v660_v36 }
  0xfb   :  { %617 = vmatprep.subr.bf16.mxu1 %v671_v0 }
  0xfe   :  { %618 = vmatpush3.bf16.msra.mxu1 %v661_v37 }
  0xff   :  { %619 = vmatprep.subr.bf16.mxu1 %v671_v0 }
 0x102   :  { %v350_v38 = vpop.f32.mrf.mxu0  ;;  %620 = vmatpush3.bf16.msra.mxu1 %v662_v42 }
 0x103   :  { %621 = vmatprep.subr.bf16.mxu1 %v671_v0 }
 0x104   :  { %v611_v39 = vpop.f32.mrf.mxu0 }
 0x106   :  { %v353_v40 = vpop.f32.mrf.mxu0  ;;  %622 = vmatpush3.bf16.msra.mxu1 %v663_v43 }
 0x107   :  { %623 = vmatprep.subr.bf16.mxu1 %v671_v0 }
 0x108   :  { %v612_v41 = vpop.f32.mrf.mxu0 }
 0x10a   :  { %624 = vmatpush3.bf16.msra.mxu1 %v664_v44 }
 0x10b   :  { %625 = vmatprep.subr.bf16.mxu1 %v671_v0 }
 0x10e   :  { %626 = vmatpush3.bf16.msra.mxu1 %v665_v45 }
 0x10f   :  { %627 = vmatprep.subr.bf16.mxu1 %v671_v0 }
 0x112   :  { %628 = vmatpush3.bf16.msra.mxu1 %v666_v46 }
 0x1b5   :  { %v262_v47 = vpop.f32.mrf.mxu1 }
 0x1b6   :  { %v351_v49 = vadd.f32 %v350_v38, %v262_v47 }
 0x1b7   :  { %v591_v50 = vpop.f32.mrf.mxu1 }
 0x1b8   :  { %v363_v51 = vadd.f32 %v507_v48, %v351_v49 }
 0x1b9   :  { %v265_v52 = vpop.f32.mrf.mxu1 }
 0x1ba   :  { %669 = vtanh.f32 %v363_v51 }
 0x1bb   :  { %v592_v53 = vpop.f32.mrf.mxu1 }
 0x1c7   :  { %v670_v54 = vpop.eup %669 }
 0x1c8   :  { %v365_v55 = vpack.c.bf16 %v670_v54, %v670_v54 }
 0x1ca   :  { %630 = vmatmul.mubr.bf16.vlgmr.msra.gmra.mxu1 %v365_v55 }
 0x28a   :  { %v471_v57 = vpop.f32.mrf.mxu1 }
 0x28b   :  { %v472_v58 = vadd.f32 %v508_v56, %v471_v57 }
 0x28c   :  { %v631_v59 = vpop.f32.mrf.mxu1 }
 0x28d   :  { %477 = vst [vmem:[%s886_s9] sm:$0xff] %v472_v58 }
 0x28e   :  { %v474_v60 = vpop.f32.mrf.mxu1 }
 0x290   :  { %v632_v61 = vpop.f32.mrf.mxu1 }

</bundles_post_ra>
